<compile_context>
chip_gen: v7x
topology: tpu7x:2x2x1
jax: 0.10.0
libtpu: 0.0.40
codegen_flags: <defaults>
</compile_context>

<pallas_src>
import functools

import jax
import jax.numpy as jnp
from jax.experimental import pallas as pl
from jax.experimental.pallas import tpu as pltpu


# -----------------------------------------------------------------------------
# Kernels
# -----------------------------------------------------------------------------
def _mlp_single_kernel(x_ref, w1_ref, b1_ref, w2_ref, b2_ref, out_ref):
    """Whole MLP in one grid step (everything fits the VMEM budget).

    Weights stay bf16 and go straight into the MXU; only the small LHS is
    cast to bf16.  Accumulation is f32.
    """
    x = x_ref[...].astype(jnp.bfloat16)
    h = jnp.dot(x, w1_ref[...], preferred_element_type=jnp.float32)
    h = jnp.maximum(h + b1_ref[...], 0.0)
    out_ref[...] = (
        jnp.dot(h.astype(jnp.bfloat16), w2_ref[...],
                preferred_element_type=jnp.float32)
        + b2_ref[...]
    ).astype(out_ref.dtype)


def _mlp_htiled_kernel(x_ref, w1_ref, b1_ref, w2_ref, b2_ref, out_ref, acc_ref):
    """Hidden-dim tiled path.

    Grid step h streams W1[:, h_chunk] and W2[h_chunk, :], computes
    relu(x @ W1_chunk + b1_chunk) and accumulates its contribution to the
    output in a (B_pad, P) f32 scratch.  W1/W2 streaming is interleaved and
    no large block stays resident across the whole kernel.
    """
    h_idx = pl.program_id(0)

    @pl.when(h_idx == 0)
    def _():
        acc_ref[...] = jnp.zeros_like(acc_ref)

    x = x_ref[...].astype(jnp.bfloat16)
    h = jnp.dot(x, w1_ref[...], preferred_element_type=jnp.float32)
    h = jnp.maximum(h + b1_ref[...], 0.0)
    acc_ref[...] += jnp.dot(h.astype(jnp.bfloat16), w2_ref[...],
                            preferred_element_type=jnp.float32)

    @pl.when(h_idx == pl.num_programs(0) - 1)
    def _():
        out_ref[...] = (acc_ref[...] + b2_ref[...]).astype(out_ref.dtype)


# -----------------------------------------------------------------------------
# VMEM budgeting helpers (inputs double-buffered by the Pallas pipeline)
# -----------------------------------------------------------------------------
def _round_up(x, m):
    return ((x + m - 1) // m) * m


def _single_step_vmem_bytes(b_pad, K, H, P, x_bytes, out_bytes):
    return (2 * b_pad * K * x_bytes
            + 2 * K * H * 2          # W1 bf16
            + 2 * H * 4              # b1 f32
            + 2 * H * P * 2          # W2 bf16
            + 2 * P * 4              # b2 f32
            + 2 * b_pad * P * out_bytes)


def _h_tiled_vmem_bytes(b_pad, K, H, P, th, x_bytes, out_bytes):
    return (2 * b_pad * K * x_bytes
            + 2 * K * th * 2         # W1 chunk bf16
            + 2 * th * 4             # b1 chunk f32
            + 2 * th * P * 2         # W2 chunk bf16
            + 2 * P * 4              # b2 f32
            + 2 * b_pad * P * out_bytes
            + b_pad * P * 4)         # f32 accumulator scratch


def _pick_h_tile(b_pad, K, H, P, x_bytes, out_bytes, budget):
    """Largest multiple of 128 dividing H whose working set fits the budget."""
    if H % 128 != 0:
        return H                      # single full-H block (full-dim block is legal)
    candidates = [t for t in range(H, 0, -128) if H % t == 0]
    for th in candidates:
        if _h_tiled_vmem_bytes(b_pad, K, H, P, th, x_bytes, out_bytes) <= budget:
            return th
    return candidates[-1]             # 128; caller raises vmem_limit_bytes


def _vmem_limit_bytes(needed):
    # At least the 32 MiB default scoped limit of v6e/v7x, plus headroom over
    # what this call actually allocates; stay below v7x's 64 MiB physical VMEM.
    return int(min(max(32 * 1024 * 1024, needed + (4 << 20)),
                   48 * 1024 * 1024))


# -----------------------------------------------------------------------------
# Wrapper
# -----------------------------------------------------------------------------
def mlp_pallas(x, w1, b1, w2, b2, *, vmem_budget_bytes=14 * 1024 * 1024):
    """Fused MLP forward: relu(x @ w1 + b1) @ w2 + b2.

    x : (B, K) activations (float32).
    w1: (K, H), w2: (H, P) weights in (in, out) layout; stored/streamed bf16.
    b1: (H,) or (1, H); b2: (P,) or (1, P).
    Returns (B, P) in x.dtype.
    """
    B, K = x.shape
    K1, H = w1.shape
    H2, P = w2.shape
    assert K1 == K and H2 == H, "weights must be (K,H) and (H,P)"

    w1 = w1.astype(jnp.bfloat16)
    w2 = w2.astype(jnp.bfloat16)
    b1 = b1.reshape(1, H).astype(jnp.float32)
    b2 = b2.reshape(1, P).astype(jnp.float32)

    out_dtype = x.dtype
    x_bytes = x.dtype.itemsize
    out_bytes = x.dtype.itemsize

    # Pad batch to the f32 sublane multiple (8) so output stores are unmasked.
    B_pad = _round_up(max(B, 1), 8)
    if B_pad != B:
        x = jnp.pad(x, ((0, B_pad - B), (0, 0)))

    single_bytes = _single_step_vmem_bytes(B_pad, K, H, P, x_bytes, out_bytes)

    if single_bytes <= vmem_budget_bytes:
        out = pl.pallas_call(
            _mlp_single_kernel,
            out_shape=jax.ShapeDtypeStruct((B_pad, P), out_dtype),
            grid_spec=pltpu.PrefetchScalarGridSpec(
                num_scalar_prefetch=0,
                grid=(1,),
                in_specs=[
                    pl.BlockSpec((B_pad, K), lambda i: (0, 0)),
                    pl.BlockSpec((K, H), lambda i: (0, 0)),
                    pl.BlockSpec((1, H), lambda i: (0, 0)),
                    pl.BlockSpec((H, P), lambda i: (0, 0)),
                    pl.BlockSpec((1, P), lambda i: (0, 0)),
                ],
                out_specs=pl.BlockSpec((B_pad, P), lambda i: (0, 0)),
            ),
            compiler_params=pltpu.CompilerParams(
                dimension_semantics=("arbitrary",),
                vmem_limit_bytes=_vmem_limit_bytes(single_bytes),
            ),
        )(x, w1, b1, w2, b2)
    else:
        th = _pick_h_tile(B_pad, K, H, P, x_bytes, out_bytes, vmem_budget_bytes)
        nh = H // th
        tiled_bytes = _h_tiled_vmem_bytes(B_pad, K, H, P, th, x_bytes, out_bytes)
        out = pl.pallas_call(
            _mlp_htiled_kernel,
            out_shape=jax.ShapeDtypeStruct((B_pad, P), out_dtype),
            grid_spec=pltpu.PrefetchScalarGridSpec(
                num_scalar_prefetch=0,
                grid=(nh,),
                in_specs=[
                    pl.BlockSpec((B_pad, K), lambda h: (0, 0)),   # grid-invariant
                    pl.BlockSpec((K, th), lambda h: (0, h)),      # W1 column chunk
                    pl.BlockSpec((1, th), lambda h: (0, h)),      # b1 chunk
                    pl.BlockSpec((th, P), lambda h: (h, 0)),      # W2 row chunk
                    pl.BlockSpec((1, P), lambda h: (0, 0)),       # b2
                ],
                out_specs=pl.BlockSpec((B_pad, P), lambda h: (0, 0)),
                scratch_shapes=[pltpu.VMEM((B_pad, P), jnp.float32)],
            ),
            compiler_params=pltpu.CompilerParams(
                dimension_semantics=("arbitrary",),
                vmem_limit_bytes=_vmem_limit_bytes(tiled_bytes),
            ),
        )(x, w1, b1, w2, b2)

    return out[:B]


# -----------------------------------------------------------------------------
# Parameters (torch.nn.Linear default init) and pure-JAX reference
# -----------------------------------------------------------------------------
def init_mlp_params(key, input_dim, hidden_dim, output_dim,
                    weight_dtype=jnp.bfloat16):
    k1, k2, k3, k4 = jax.random.split(key, 4)

    def uniform(k, shape, fan_in):
        bound = 1.0 / jnp.sqrt(jnp.float32(fan_in))
        return jax.random.uniform(k, shape, jnp.float32, -bound, bound)

    return {
        "w1": uniform(k1, (input_dim, hidden_dim), input_dim).astype(weight_dtype),
        "b1": uniform(k2, (hidden_dim,), input_dim),
        "w2": uniform(k3, (hidden_dim, output_dim), hidden_dim).astype(weight_dtype),
        "b2": uniform(k4, (output_dim,), hidden_dim),
    }


def mlp_reference(x, w1, b1, w2, b2):
    h = jnp.maximum(x @ w1.astype(jnp.float32) + b1.astype(jnp.float32), 0.0)
    return h @ w2.astype(jnp.float32) + b2.astype(jnp.float32)


# -----------------------------------------------------------------------------
# Demo / self-check
# -----------------------------------------------------------------------------
if __name__ == "__main__":
    key = jax.random.PRNGKey(0)
    kp1, kp2, kx1, kx2 = jax.random.split(key, 4)

    B = 2

    # Case 1: exercised twice — default budget (single fused step) and a tiny
    # 1 MiB budget to force the H-tiled accumulation path (th=128, 2 steps).
    IN1, HID1, OUT1 = 1024, 256, 128
    p1 = init_mlp_params(kp1, IN1, HID1, OUT1)
    x1 = jax.random.normal(kx1, (B, IN1), jnp.float32)

    # Case 2: smaller shapes, single fused step.
    IN2, HID2, OUT2 = 384, 256, 128
    p2 = init_mlp_params(kp2, IN2, HID2, OUT2)
    x2 = jax.random.normal(kx2, (B, IN2), jnp.float32)

    run = jax.jit(mlp_pallas)
    run_tiled = jax.jit(functools.partial(mlp_pallas, vmem_budget_bytes=1 << 20))

    y1 = run(x1, p1["w1"], p1["b1"], p1["w2"], p1["b2"])
    y1_tiled = run_tiled(x1, p1["w1"], p1["b1"], p1["w2"], p1["b2"])
    y2 = run(x2, p2["w1"], p2["b1"], p2["w2"], p2["b2"])
    jax.block_until_ready((y1, y1_tiled, y2))

    r1 = mlp_reference(x1, p1["w1"], p1["b1"], p1["w2"], p1["b2"])
    r2 = mlp_reference(x2, p2["w1"], p2["b1"], p2["w2"], p2["b2"])

    assert y1.shape == (B, OUT1) and y1.dtype == jnp.float32
    assert y1_tiled.shape == (B, OUT1) and y1_tiled.dtype == jnp.float32
    assert y2.shape == (B, OUT2) and y2.dtype == jnp.float32
    assert jnp.allclose(y1, r1, rtol=2e-2, atol=2e-2), "single-step path mismatch"
    assert jnp.allclose(y1_tiled, r1, rtol=2e-2, atol=2e-2), "H-tiled path mismatch"
    assert jnp.allclose(y2, r2, rtol=2e-2, atol=2e-2), "case-2 mismatch"
    print("KERNEL_OK")
</pallas_src>

<mosaic_0001>
module attributes {stable_mosaic.version = 11 : i64} {
  func.func @_mlp_single_kernel(%arg0: i32, %arg1: memref<8x1024xf32, #tpu.memory_space<vmem>>, %arg2: memref<1024x256xbf16, #tpu.memory_space<vmem>>, %arg3: memref<1x256xf32, #tpu.memory_space<vmem>>, %arg4: memref<256x128xbf16, #tpu.memory_space<vmem>>, %arg5: memref<1x128xf32, #tpu.memory_space<vmem>>, %arg6: memref<8x128xf32, #tpu.memory_space<vmem>>) attributes {dimension_semantics = [#tpu.dimension_semantics<arbitrary>], iteration_bounds = array<i64: 1>, scalar_prefetch = 0 : i64, scratch_operands = 0 : i64, tpu.core_type = #tpu.core_type<tc>, window_params = [{pipeline_mode = #tpu.pipeline_mode<synchronous>, transform_indices = @transform_0, window_bounds = array<i64: 8, 1024>}, {pipeline_mode = #tpu.pipeline_mode<synchronous>, transform_indices = @transform_1, window_bounds = array<i64: 1024, 256>}, {pipeline_mode = #tpu.pipeline_mode<synchronous>, transform_indices = @transform_2, window_bounds = array<i64: 1, 256>}, {pipeline_mode = #tpu.pipeline_mode<synchronous>, transform_indices = @transform_3, window_bounds = array<i64: 256, 128>}, {pipeline_mode = #tpu.pipeline_mode<synchronous>, transform_indices = @transform_4, window_bounds = array<i64: 1, 128>}, {pipeline_mode = #tpu.pipeline_mode<synchronous>, transform_indices = @transform_5, window_bounds = array<i64: 8, 128>}]} {
    %c0 = arith.constant 0 : index
    %c0_0 = arith.constant 0 : index
    %0 = vector.load %arg1[%c0, %c0_0] : memref<8x1024xf32, #tpu.memory_space<vmem>>, vector<8x1024xf32>
    %1 = arith.truncf %0 : vector<8x1024xf32> to vector<8x1024xbf16>
    %c0_1 = arith.constant 0 : index
    %c0_2 = arith.constant 0 : index
    %2 = vector.load %arg2[%c0_1, %c0_2] : memref<1024x256xbf16, #tpu.memory_space<vmem>>, vector<1024x256xbf16>
    %cst = arith.constant dense<0.000000e+00> : vector<8x256xf32>
    %3 = tpu.matmul %1, %2, %cst {dimension_numbers = #tpu.dot_dimension_numbers<[1], [0], [0], [1], [0, 0, 1, 1], [], []>} : vector<8x1024xbf16>, vector<1024x256xbf16>, vector<8x256xf32> -> vector<8x256xf32>
    %c0_3 = arith.constant 0 : index
    %c0_4 = arith.constant 0 : index
    %4 = vector.load %arg3[%c0_3, %c0_4] : memref<1x256xf32, #tpu.memory_space<vmem>>, vector<1x256xf32>
    %5 = vector.broadcast %4 : vector<1x256xf32> to vector<8x256xf32>
    %6 = arith.addf %3, %5 : vector<8x256xf32>
    %cst_5 = arith.constant 0.000000e+00 : f32
    %7 = vector.broadcast %cst_5 : f32 to vector<8x256xf32>
    %8 = arith.maximumf %6, %7 : vector<8x256xf32>
    %9 = arith.truncf %8 : vector<8x256xf32> to vector<8x256xbf16>
    %c0_6 = arith.constant 0 : index
    %c0_7 = arith.constant 0 : index
    %10 = vector.load %arg4[%c0_6, %c0_7] : memref<256x128xbf16, #tpu.memory_space<vmem>>, vector<256x128xbf16>
    %cst_8 = arith.constant dense<0.000000e+00> : vector<8x128xf32>
    %11 = tpu.matmul %9, %10, %cst_8 {dimension_numbers = #tpu.dot_dimension_numbers<[1], [0], [0], [1], [0, 0, 1, 1], [], []>} : vector<8x256xbf16>, vector<256x128xbf16>, vector<8x128xf32> -> vector<8x128xf32>
    %c0_9 = arith.constant 0 : index
    %c0_10 = arith.constant 0 : index
    %12 = vector.load %arg5[%c0_9, %c0_10] : memref<1x128xf32, #tpu.memory_space<vmem>>, vector<1x128xf32>
    %13 = vector.broadcast %12 : vector<1x128xf32> to vector<8x128xf32>
    %14 = arith.addf %11, %13 : vector<8x128xf32>
    %c0_11 = arith.constant 0 : index
    %c0_12 = arith.constant 0 : index
    %15 = vector.load %arg6[%c0_11, %c0_12] : memref<8x128xf32, #tpu.memory_space<vmem>>, vector<8x128xf32>
    tpu.vector_store %arg6[%c0_11, %c0_12], %14 {strides = array<i32>} : memref<8x128xf32, #tpu.memory_space<vmem>>, vector<8x128xf32>,
    return
  }
  func.func @transform_0(%arg0: i32) -> (i32, i32) {
    %c0_i32 = arith.constant 0 : i32
    %c0_i32_0 = arith.constant 0 : i32
    %c0_i32_1 = arith.constant 0 : i32
    return %c0_i32, %c0_i32_0 : i32, i32
  }
  func.func @transform_1(%arg0: i32) -> (i32, i32) {
    %c0_i32 = arith.constant 0 : i32
    %c0_i32_0 = arith.constant 0 : i32
    %c0_i32_1 = arith.constant 0 : i32
    return %c0_i32, %c0_i32_0 : i32, i32
  }
  func.func @transform_2(%arg0: i32) -> (i32, i32) {
    %c0_i32 = arith.constant 0 : i32
    %c0_i32_0 = arith.constant 0 : i32
    %c0_i32_1 = arith.constant 0 : i32
    return %c0_i32, %c0_i32_0 : i32, i32
  }
  func.func @transform_3(%arg0: i32) -> (i32, i32) {
    %c0_i32 = arith.constant 0 : i32
    %c0_i32_0 = arith.constant 0 : i32
    %c0_i32_1 = arith.constant 0 : i32
    return %c0_i32, %c0_i32_0 : i32, i32
  }
  func.func @transform_4(%arg0: i32) -> (i32, i32) {
    %c0_i32 = arith.constant 0 : i32
    %c0_i32_0 = arith.constant 0 : i32
    %c0_i32_1 = arith.constant 0 : i32
    return %c0_i32, %c0_i32_0 : i32, i32
  }
  func.func @transform_5(%arg0: i32) -> (i32, i32) {
    %c0_i32 = arith.constant 0 : i32
    %c0_i32_0 = arith.constant 0 : i32
    %c0_i32_1 = arith.constant 0 : i32
    return %c0_i32, %c0_i32_0 : i32, i32
  }
}

</mosaic_0001>

<bundles_post_ra>
// kernel: mlp_pallas.1
= control target key start
LH: loop header
LB: loop body
LE: loop exit
PB: predicated region body
PF: predicated region fallthrough
CT: control target
= control target key end

     0   :  { %10 = vsyncpa [#allocation3], 0  ;;  %s1729_s0 = inlined_call_operand.vmem [shape: f32[8,1024], index: 0, kind: input, shape index: {}]   ;;  %s1730_s1 = inlined_call_operand.hbm [shape: bf16[1024,256], index: 1, kind: input, shape index: {}]   ;;  %s1731_s2 = inlined_call_operand.vmem [shape: f32[1,256], index: 2, kind: input, shape index: {}]   ;;  %s1732_s3 = inlined_call_operand.hbm [shape: bf16[256,128], index: 3, kind: input, shape index: {}]   ;;  %s1733_s4 = inlined_call_operand.vmem [shape: f32[1,128], index: 4, kind: input, shape index: {}]   ;;  %s1734_s5 = inlined_call_operand.vmem [shape: f32[8,128], index: 5, kind: output, shape index: {}]  }
   0x1   :  { %11 = vsyncpa [#allocation5], 0  ;;  %s1636_s18 = smov [#allocation2]   ;;  %s1588_s22 = scalar_lea.hbm %s1730_s1, 16384 }
   0x2   :  { %s19_s19 = sshll.u32 %s1636_s18, 4  ;;  %p1589_p0 = scmp.ne.s32.totalorder %s1730_s1, %s1588_s22  ;;  %s20_s19 = int_to_ptr.vmem [resolvable:$true] %s19_s19 }
   0x3   :  { %p1592_p1 = scmp.lt.u32.totalorder %s1588_s22, %s1730_s1 }
   0x5   :  { %p1594_p2 = pnand %p1592_p1, %p1589_p0 }
   0x7   :  { %1597 = shalt.err (!%p1594_p2)
}
   0x8   :  { %s1598_s27 = scalar_lea.vmem %s20_s19, 16384  ;;  %p1603_p4 = scmp.lt.s32.totalorder %s20_s19, %s20_s19 }
   0x9   :  { %p1599_p3 = scmp.ne.s32.totalorder %s20_s19, %s1598_s27  ;;  %p1604_p5 = scmp.lt.s32.totalorder %s1598_s27, %s1598_s27 }
   0xb   :  { %p1605_p6 = por %p1604_p5, %p1603_p4 }
   0xd   :  { %p1606_p7 = pnand %p1605_p6, %p1599_p3 }
   0xf   :  { %1609 = shalt.err (!%p1606_p7)
}
  0x10   :  { %s1637_s28 = smov 128   ;;  %s1638_s29 = smov 8  }
  0x11   :  { %25 = dma.hbm_to_vmem [thread:$0]  %s1730_s1, 16384, %s20_s19, [#allocation3], %s1637_s28, %s1637_s28, %s1638_s29  }
  0x12   :  { %s1639_s7 = smov [#allocation4]   ;;  %s1610_s11 = scalar_lea.hbm %s1732_s3, 2048 }
  0x13   :  { %s33_s8 = sshll.u32 %s1639_s7, 4  ;;  %p1611_p8 = scmp.ne.s32.totalorder %s1732_s3, %s1610_s11  ;;  %s34_s8 = int_to_ptr.vmem [resolvable:$true] %s33_s8 }
  0x14   :  { %p1614_p9 = scmp.lt.u32.totalorder %s1610_s11, %s1732_s3 }
  0x16   :  { %p1616_p10 = pnand %p1614_p9, %p1611_p8 }
  0x18   :  { %1619 = shalt.err (!%p1616_p10)
}
  0x19   :  { %s1620_s16 = scalar_lea.vmem %s34_s8, 2048  ;;  %p1625_p12 = scmp.lt.s32.totalorder %s34_s8, %s34_s8 }
  0x1a   :  { %p1621_p11 = scmp.ne.s32.totalorder %s34_s8, %s1620_s16  ;;  %p1626_p13 = scmp.lt.s32.totalorder %s1620_s16, %s1620_s16 }
  0x1c   :  { %p1627_p0 = por %p1626_p13, %p1625_p12 }
  0x1e   :  { %p1628_p1 = pnand %p1627_p0, %p1621_p11 }
  0x20   :  { %1631 = shalt.err (!%p1628_p1)
}
  0x21   :  { %s1640_s1 = smov 64   ;;  %s1641_s17 = smov 4  }
  0x22   :  { %39 = dma.hbm_to_vmem [thread:$0]  %s1732_s3, 2048, %s34_s8, [#allocation5], %s1640_s1, %s1640_s1, %s1641_s17  }
  0x23   :  { %1632 = dma.done.wait [#allocation3], 16384  }
  0x24   :  { %1633 = vsyncadd [#allocation3], 4294950912 }
  0x25   :  { %1634 = dma.done.wait [#allocation5], 2048  }
  0x26   :  { %1635 = vsyncadd [#allocation5], 4294965248  ;;  %v1380_v0 = vld [vmem:[#allocation2 + $0x4] ss:$8 sps:$4 sm:$0xff]   ;;  %v1384_v2 = vld [vmem:[#allocation2] ss:$8 sps:$4 sm:$0xff]  }
  0x27   :  { %v1382_v1 = vld [vmem:[#allocation2 + $0x204] ss:$8 sps:$4 sm:$0xff]   ;;  %845 = vmatprep.subr.bf16.mxu1 %v1380_v0  ;;  %v1385_v3 = vld [vmem:[#allocation2 + $0x200] ss:$8 sps:$4 sm:$0xff]   ;;  %v1386_v4 = vld [vmem:[#allocation2 + $0x14] ss:$8 sps:$4 sm:$0xff]  }
  0x28   :  { %927 = vmatprep.subr.bf16.mxu0 %v1382_v1  ;;  %846 = vmatpush1.bf16.msra.mxu1 %v1384_v2  ;;  %v1388_v5 = vld [vmem:[#allocation2 + $0x214] ss:$8 sps:$4 sm:$0xff]   ;;  %v1390_v6 = vld [vmem:[#allocation2 + $0x10] ss:$8 sps:$4 sm:$0xff]   ;;  %v1392_v8 = vld [vmem:[#allocation2 + $0x24] ss:$8 sps:$4 sm:$0xff]  }
  0x29   :  { %928 = vmatpush1.bf16.msra.mxu0 %v1385_v3  ;;  %847 = vmatprep.subr.bf16.mxu1 %v1386_v4  ;;  %v1391_v7 = vld [vmem:[#allocation2 + $0x210] ss:$8 sps:$4 sm:$0xff]   ;;  %v1394_v9 = vld [vmem:[#allocation2 + $0x224] ss:$8 sps:$4 sm:$0xff]   ;;  %v1396_v10 = vld [vmem:[#allocation2 + $0x20] ss:$8 sps:$4 sm:$0xff]  }
  0x2a   :  { %929 = vmatprep.subr.bf16.mxu0 %v1388_v5  ;;  %v1397_v11 = vld [vmem:[#allocation2 + $0x220] ss:$8 sps:$4 sm:$0xff]   ;;  %v1398_v12 = vld [vmem:[#allocation2 + $0x34] ss:$8 sps:$4 sm:$0xff]   ;;  %v1402_v14 = vld [vmem:[#allocation2 + $0x30] ss:$8 sps:$4 sm:$0xff]  }
  0x2b   :  { %v1400_v13 = vld [vmem:[#allocation2 + $0x234] ss:$8 sps:$4 sm:$0xff]   ;;  %v1403_v15 = vld [vmem:[#allocation2 + $0x230] ss:$8 sps:$4 sm:$0xff]   ;;  %v1404_v16 = vld [vmem:[#allocation2 + $0x44] ss:$8 sps:$4 sm:$0xff]  }
  0x2c   :  { %848 = vmatpush1.bf16.msra.mxu1 %v1390_v6  ;;  %v1406_v17 = vld [vmem:[#allocation2 + $0x244] ss:$8 sps:$4 sm:$0xff]   ;;  %v1408_v18 = vld [vmem:[#allocation2 + $0x40] ss:$8 sps:$4 sm:$0xff]   ;;  %v1410_v20 = vld [vmem:[#allocation2 + $0x54] ss:$8 sps:$4 sm:$0xff]  }
  0x2d   :  { %930 = vmatpush1.bf16.msra.mxu0 %v1391_v7  ;;  %849 = vmatprep.subr.bf16.mxu1 %v1392_v8  ;;  %v1409_v19 = vld [vmem:[#allocation2 + $0x240] ss:$8 sps:$4 sm:$0xff]   ;;  %v1412_v21 = vld [vmem:[#allocation2 + $0x254] ss:$8 sps:$4 sm:$0xff]   ;;  %v1414_v22 = vld [vmem:[#allocation2 + $0x50] ss:$8 sps:$4 sm:$0xff]  }
  0x2e   :  { %931 = vmatprep.subr.bf16.mxu0 %v1394_v9  ;;  %v1415_v23 = vld [vmem:[#allocation2 + $0x250] ss:$8 sps:$4 sm:$0xff]   ;;  %v1416_v24 = vld [vmem:[#allocation2 + $0x64] ss:$8 sps:$4 sm:$0xff]   ;;  %v1420_v26 = vld [vmem:[#allocation2 + $0x60] ss:$8 sps:$4 sm:$0xff]  }
  0x2f   :  { %v1418_v25 = vld [vmem:[#allocation2 + $0x264] ss:$8 sps:$4 sm:$0xff]   ;;  %v1421_v27 = vld [vmem:[#allocation2 + $0x260] ss:$8 sps:$4 sm:$0xff]   ;;  %v1422_v28 = vld [vmem:[#allocation2 + $0x74] ss:$8 sps:$4 sm:$0xff]  }
  0x30   :  { %850 = vmatpush1.bf16.msra.mxu1 %v1396_v10  ;;  %v1424_v29 = vld [vmem:[#allocation2 + $0x274] ss:$8 sps:$4 sm:$0xff]   ;;  %v1426_v30 = vld [vmem:[#allocation2 + $0x70] ss:$8 sps:$4 sm:$0xff]   ;;  %v1428_v32 = vld [vmem:[#allocation2 + $0x84] ss:$8 sps:$4 sm:$0xff]  }
  0x31   :  { %932 = vmatpush1.bf16.msra.mxu0 %v1397_v11  ;;  %851 = vmatprep.subr.bf16.mxu1 %v1398_v12  ;;  %v1427_v31 = vld [vmem:[#allocation2 + $0x270] ss:$8 sps:$4 sm:$0xff]   ;;  %v1430_v33 = vld [vmem:[#allocation2 + $0x284] ss:$8 sps:$4 sm:$0xff]   ;;  %v1432_v34 = vld [vmem:[#allocation2 + $0x80] ss:$8 sps:$4 sm:$0xff]  }
  0x32   :  { %933 = vmatprep.subr.bf16.mxu0 %v1400_v13  ;;  %v1433_v35 = vld [vmem:[#allocation2 + $0x280] ss:$8 sps:$4 sm:$0xff]   ;;  %v1434_v36 = vld [vmem:[#allocation2 + $0x94] ss:$8 sps:$4 sm:$0xff]   ;;  %v1438_v38 = vld [vmem:[#allocation2 + $0x90] ss:$8 sps:$4 sm:$0xff]  }
  0x33   :  { %v1436_v37 = vld [vmem:[#allocation2 + $0x294] ss:$8 sps:$4 sm:$0xff]   ;;  %v1439_v39 = vld [vmem:[#allocation2 + $0x290] ss:$8 sps:$4 sm:$0xff]   ;;  %v1440_v40 = vld [vmem:[#allocation2 + $0xa4] ss:$8 sps:$4 sm:$0xff]  }
  0x34   :  { %852 = vmatpush1.bf16.msra.mxu1 %v1402_v14  ;;  %v1442_v41 = vld [vmem:[#allocation2 + $0x2a4] ss:$8 sps:$4 sm:$0xff]   ;;  %v1444_v42 = vld [vmem:[#allocation2 + $0xa0] ss:$8 sps:$4 sm:$0xff]   ;;  %v1446_v44 = vld [vmem:[#allocation2 + $0xb4] ss:$8 sps:$4 sm:$0xff]  }
  0x35   :  { %934 = vmatpush1.bf16.msra.mxu0 %v1403_v15  ;;  %853 = vmatprep.subr.bf16.mxu1 %v1404_v16  ;;  %v1445_v43 = vld [vmem:[#allocation2 + $0x2a0] ss:$8 sps:$4 sm:$0xff]   ;;  %v1448_v45 = vld [vmem:[#allocation2 + $0x2b4] ss:$8 sps:$4 sm:$0xff]   ;;  %v1450_v47 = vld [vmem:[#allocation2 + $0xb0] ss:$8 sps:$4 sm:$0xff]  }
  0x36   :  { %935 = vmatprep.subr.bf16.mxu0 %v1406_v17  ;;  %v50_v46 = vld [vmem:[%s1729_s0 + $0x8] sm:$0xff]  ;;  %v1451_v49 = vld [vmem:[#allocation2 + $0x2b0] ss:$8 sps:$4 sm:$0xff]   ;;  %v1458_v56 = vld [vmem:[#allocation2 + $0xd4] ss:$8 sps:$4 sm:$0xff]  }
  0x37   :  { %v58_v48 = vpack.c.bf16 %v50_v46, %v50_v46  ;;  %v54_v50 = vld [vmem:[%s1729_s0 + $0x28] sm:$0xff]  ;;  %v1460_v57 = vld [vmem:[#allocation2 + $0x2d4] ss:$8 sps:$4 sm:$0xff]   ;;  %v1462_v58 = vld [vmem:[#allocation2 + $0xd0] ss:$8 sps:$4 sm:$0xff]  }
  0x38   :  { %854 = vmatpush1.bf16.msra.mxu1 %v1408_v18  ;;  %v1452_v51 = vld [vmem:[#allocation2 + $0xc4] ss:$8 sps:$4 sm:$0xff]   ;;  %v62_v53 = vpack.c.bf16 %v54_v50, %v54_v50  ;;  %v1456_v54 = vld [vmem:[#allocation2 + $0xc0] ss:$8 sps:$4 sm:$0xff]   ;;  %v1463_v59 = vld [vmem:[#allocation2 + $0x2d0] ss:$8 sps:$4 sm:$0xff]  }
  0x39   :  { %936 = vmatpush1.bf16.msra.mxu0 %v1409_v19  ;;  %855 = vmatprep.subr.bf16.mxu1 %v1410_v20  ;;  %v1454_v52 = vld [vmem:[#allocation2 + $0x2c4] ss:$8 sps:$4 sm:$0xff]   ;;  %v1457_v55 = vld [vmem:[#allocation2 + $0x2c0] ss:$8 sps:$4 sm:$0xff]   ;;  %v1470_v0 = vld [vmem:[#allocation2 + $0xf4] ss:$8 sps:$4 sm:$0xff]  }
  0x3a   :  { %937 = vmatprep.subr.bf16.mxu0 %v1412_v21  ;;  %877 = vmatprep.mubr.bf16.mxu1 %v58_v48  ;;  %v1464_v60 = vld [vmem:[#allocation2 + $0xe4] ss:$8 sps:$4 sm:$0xff]   ;;  %v1468_v62 = vld [vmem:[#allocation2 + $0xe0] ss:$8 sps:$4 sm:$0xff]   ;;  %v1472_v1 = vld [vmem:[#allocation2 + $0x2f4] ss:$8 sps:$4 sm:$0xff]  }
  0x3b   :  { %959 = vmatprep.mubr.bf16.mxu0 %v62_v53  ;;  %v1466_v61 = vld [vmem:[#allocation2 + $0x2e4] ss:$8 sps:$4 sm:$0xff]   ;;  %v1469_v63 = vld [vmem:[#allocation2 + $0x2e0] ss:$8 sps:$4 sm:$0xff]   ;;  %v1474_v2 = vld [vmem:[#allocation2 + $0xf0] ss:$8 sps:$4 sm:$0xff]  }
  0x3c   :  { %856 = vmatpush1.bf16.msra.mxu1 %v1414_v22  ;;  %v1475_v3 = vld [vmem:[#allocation2 + $0x2f0] ss:$8 sps:$4 sm:$0xff]   ;;  %v1478_v4 = vld [vmem:[#allocation2 + $0x104] ss:$8 sps:$4 sm:$0xff]   ;;  %v1476_v8 = vld [vmem:[#allocation2 + $0x100] ss:$8 sps:$4 sm:$0xff]  }
  0x3d   :  { %938 = vmatpush1.bf16.msra.mxu0 %v1415_v23  ;;  %857 = vmatprep.subr.bf16.mxu1 %v1416_v24  ;;  %v49_v5 = vld [vmem:[%s1729_s0] sm:$0xff]  ;;  %v1484_v12 = vld [vmem:[#allocation2 + $0x114] ss:$8 sps:$4 sm:$0xff]   ;;  %v1482_v14 = vld [vmem:[#allocation2 + $0x110] ss:$8 sps:$4 sm:$0xff]  }
  0x3e   :  { %939 = vmatprep.subr.bf16.mxu0 %v1418_v25  ;;  %v53_v6 = vld [vmem:[%s1729_s0 + $0x20] sm:$0xff]  ;;  %v57_v10 = vpack.c.bf16 %v49_v5, %v49_v5  ;;  %v1487_v13 = vld [vmem:[#allocation2 + $0x314] ss:$8 sps:$4 sm:$0xff]   ;;  %v1485_v15 = vld [vmem:[#allocation2 + $0x310] ss:$8 sps:$4 sm:$0xff]  }
  0x3f   :  { %v1481_v7 = vld [vmem:[#allocation2 + $0x304] ss:$8 sps:$4 sm:$0xff]   ;;  %v1479_v9 = vld [vmem:[#allocation2 + $0x300] ss:$8 sps:$4 sm:$0xff]   ;;  %v61_v11 = vpack.c.bf16 %v53_v6, %v53_v6  ;;  %v1496_v20 = vld [vmem:[#allocation2 + $0x134] ss:$8 sps:$4 sm:$0xff]  }
  0x40   :  { %858 = vmatpush1.bf16.msra.mxu1 %v1420_v26  ;;  %v1490_v16 = vld [vmem:[#allocation2 + $0x124] ss:$8 sps:$4 sm:$0xff]   ;;  %v1488_v18 = vld [vmem:[#allocation2 + $0x120] ss:$8 sps:$4 sm:$0xff]   ;;  %v1499_v21 = vld [vmem:[#allocation2 + $0x334] ss:$8 sps:$4 sm:$0xff]  }
  0x41   :  { %940 = vmatpush1.bf16.msra.mxu0 %v1421_v27  ;;  %859 = vmatprep.subr.bf16.mxu1 %v1422_v28  ;;  %v1493_v17 = vld [vmem:[#allocation2 + $0x324] ss:$8 sps:$4 sm:$0xff]   ;;  %v1491_v19 = vld [vmem:[#allocation2 + $0x320] ss:$8 sps:$4 sm:$0xff]   ;;  %v1494_v22 = vld [vmem:[#allocation2 + $0x130] ss:$8 sps:$4 sm:$0xff]  }
  0x42   :  { %941 = vmatprep.subr.bf16.mxu0 %v1424_v29  ;;  %v1497_v23 = vld [vmem:[#allocation2 + $0x330] ss:$8 sps:$4 sm:$0xff]   ;;  %v1502_v24 = vld [vmem:[#allocation2 + $0x144] ss:$8 sps:$4 sm:$0xff]   ;;  %v1500_v26 = vld [vmem:[#allocation2 + $0x140] ss:$8 sps:$4 sm:$0xff]  }
  0x43   :  { %v1505_v25 = vld [vmem:[#allocation2 + $0x344] ss:$8 sps:$4 sm:$0xff]   ;;  %v1503_v27 = vld [vmem:[#allocation2 + $0x340] ss:$8 sps:$4 sm:$0xff]   ;;  %v1508_v28 = vld [vmem:[#allocation2 + $0x154] ss:$8 sps:$4 sm:$0xff]  }
  0x44   :  { %860 = vmatpush1.bf16.msra.mxu1 %v1426_v30  ;;  %v1511_v29 = vld [vmem:[#allocation2 + $0x354] ss:$8 sps:$4 sm:$0xff]   ;;  %v1506_v30 = vld [vmem:[#allocation2 + $0x150] ss:$8 sps:$4 sm:$0xff]   ;;  %v1524_v46 = vld [vmem:[#allocation2 + $0x180] ss:$8 sps:$4 sm:$0xff]  }
  0x45   :  { %942 = vmatpush1.bf16.msra.mxu0 %v1427_v31  ;;  %861 = vmatprep.subr.bf16.mxu1 %v1428_v32  ;;  %v1509_v31 = vld [vmem:[#allocation2 + $0x350] ss:$8 sps:$4 sm:$0xff]   ;;  %v1514_v32 = vld [vmem:[#allocation2 + $0x164] ss:$8 sps:$4 sm:$0xff]   ;;  %v1532_v48 = vld [vmem:[#allocation2 + $0x194] ss:$8 sps:$4 sm:$0xff]  }
  0x46   :  { %943 = vmatprep.subr.bf16.mxu0 %v1430_v33  ;;  %v1517_v33 = vld [vmem:[#allocation2 + $0x364] ss:$8 sps:$4 sm:$0xff]   ;;  %v1530_v50 = vld [vmem:[#allocation2 + $0x190] ss:$8 sps:$4 sm:$0xff]   ;;  %v1560_v6 = vld [vmem:[#allocation2 + $0x1e0] ss:$8 sps:$4 sm:$0xff]  }
  0x47   :  { %v1541_v53 = vld [vmem:[#allocation2 + $0x3a4] ss:$8 sps:$4 sm:$0xff]  }
  0x48   :  { %862 = vmatpush1.bf16.msra.mxu1 %v1432_v34  ;;  %v52_v34 = vld [vmem:[%s1729_s0 + $0x18] sm:$0xff]  ;;  %v1565_v5 = vld [vmem:[#allocation2 + $0x3e4] ss:$8 sps:$4 sm:$0xff]  }
  0x49   :  { %944 = vmatpush1.bf16.msra.mxu0 %v1433_v35  ;;  %863 = vmatprep.subr.bf16.mxu1 %v1434_v36  ;;  %v1512_v35 = vld [vmem:[#allocation2 + $0x160] ss:$8 sps:$4 sm:$0xff]  }
  0x4a   :  { %945 = vmatprep.subr.bf16.mxu0 %v1436_v37  ;;  %v1515_v36 = vld [vmem:[#allocation2 + $0x360] ss:$8 sps:$4 sm:$0xff]   ;;  %v60_v37 = vpack.c.bf16 %v52_v34, %v52_v34 }
  0x4c   :  { %864 = vmatpush1.bf16.msra.mxu1 %v1438_v38  ;;  %v56_v38 = vld [vmem:[%s1729_s0 + $0x38] sm:$0xff] }
  0x4d   :  { %946 = vmatpush1.bf16.msra.mxu0 %v1439_v39  ;;  %865 = vmatprep.subr.bf16.mxu1 %v1440_v40  ;;  %v1520_v39 = vld [vmem:[#allocation2 + $0x174] ss:$8 sps:$4 sm:$0xff]   ;;  %v64_v40 = vpack.c.bf16 %v56_v38, %v56_v38 }
  0x4e   :  { %947 = vmatprep.subr.bf16.mxu0 %v1442_v41  ;;  %v1523_v41 = vld [vmem:[#allocation2 + $0x374] ss:$8 sps:$4 sm:$0xff]  }
  0x50   :  { %866 = vmatpush1.bf16.msra.mxu1 %v1444_v42  ;;  %v1518_v42 = vld [vmem:[#allocation2 + $0x170] ss:$8 sps:$4 sm:$0xff]  }
  0x51   :  { %948 = vmatpush1.bf16.msra.mxu0 %v1445_v43  ;;  %867 = vmatprep.subr.bf16.mxu1 %v1446_v44  ;;  %v1521_v43 = vld [vmem:[#allocation2 + $0x370] ss:$8 sps:$4 sm:$0xff]   ;;  %v1526_v44 = vld [vmem:[#allocation2 + $0x184] ss:$8 sps:$4 sm:$0xff]  }
  0x52   :  { %949 = vmatprep.subr.bf16.mxu0 %v1448_v45  ;;  %v1529_v45 = vld [vmem:[#allocation2 + $0x384] ss:$8 sps:$4 sm:$0xff]  }
  0x54   :  { %868 = vmatpush1.bf16.msra.mxu1 %v1450_v47  ;;  %v1527_v47 = vld [vmem:[#allocation2 + $0x380] ss:$8 sps:$4 sm:$0xff]  }
  0x55   :  { %950 = vmatpush1.bf16.msra.mxu0 %v1451_v49  ;;  %869 = vmatprep.subr.bf16.mxu1 %v1452_v51  ;;  %v1535_v49 = vld [vmem:[#allocation2 + $0x394] ss:$8 sps:$4 sm:$0xff]   ;;  %v1533_v51 = vld [vmem:[#allocation2 + $0x390] ss:$8 sps:$4 sm:$0xff]  }
  0x56   :  { %951 = vmatprep.subr.bf16.mxu0 %v1454_v52  ;;  %v1538_v52 = vld [vmem:[#allocation2 + $0x1a4] ss:$8 sps:$4 sm:$0xff]  }
  0x58   :  { %870 = vmatpush1.bf16.msra.mxu1 %v1456_v54  ;;  %v1536_v54 = vld [vmem:[#allocation2 + $0x1a0] ss:$8 sps:$4 sm:$0xff]  }
  0x59   :  { %952 = vmatpush1.bf16.msra.mxu0 %v1457_v55  ;;  %871 = vmatprep.subr.bf16.mxu1 %v1458_v56  ;;  %v1539_v55 = vld [vmem:[#allocation2 + $0x3a0] ss:$8 sps:$4 sm:$0xff]   ;;  %v1544_v56 = vld [vmem:[#allocation2 + $0x1b4] ss:$8 sps:$4 sm:$0xff]  }
  0x5a   :  { %953 = vmatprep.subr.bf16.mxu0 %v1460_v57  ;;  %v1547_v57 = vld [vmem:[#allocation2 + $0x3b4] ss:$8 sps:$4 sm:$0xff]  }
  0x5c   :  { %872 = vmatpush1.bf16.msra.mxu1 %v1462_v58  ;;  %v1542_v58 = vld [vmem:[#allocation2 + $0x1b0] ss:$8 sps:$4 sm:$0xff]  }
  0x5d   :  { %954 = vmatpush1.bf16.msra.mxu0 %v1463_v59  ;;  %873 = vmatprep.subr.bf16.mxu1 %v1464_v60  ;;  %v1545_v59 = vld [vmem:[#allocation2 + $0x3b0] ss:$8 sps:$4 sm:$0xff]   ;;  %v1550_v60 = vld [vmem:[#allocation2 + $0x1c4] ss:$8 sps:$4 sm:$0xff]  }
  0x5e   :  { %955 = vmatprep.subr.bf16.mxu0 %v1466_v61  ;;  %v1553_v61 = vld [vmem:[#allocation2 + $0x3c4] ss:$8 sps:$4 sm:$0xff]  }
  0x60   :  { %874 = vmatpush1.bf16.msra.mxu1 %v1468_v62  ;;  %v1548_v62 = vld [vmem:[#allocation2 + $0x1c0] ss:$8 sps:$4 sm:$0xff]  }
  0x61   :  { %956 = vmatpush1.bf16.msra.mxu0 %v1469_v63  ;;  %875 = vmatprep.subr.bf16.mxu1 %v1470_v0  ;;  %v1551_v63 = vld [vmem:[#allocation2 + $0x3c0] ss:$8 sps:$4 sm:$0xff]   ;;  %v1556_v0 = vld [vmem:[#allocation2 + $0x1d4] ss:$8 sps:$4 sm:$0xff]  }
  0x62   :  { %957 = vmatprep.subr.bf16.mxu0 %v1472_v1  ;;  %v1559_v1 = vld [vmem:[#allocation2 + $0x3d4] ss:$8 sps:$4 sm:$0xff]  }
  0x64   :  { %876 = vmatpush1.bf16.msra.mxu1 %v1474_v2  ;;  %v1554_v2 = vld [vmem:[#allocation2 + $0x1d0] ss:$8 sps:$4 sm:$0xff]  }
  0x65   :  { %958 = vmatpush1.bf16.msra.mxu0 %v1475_v3  ;;  %886 = vmatprep.subr.bf16.mxu1 %v1478_v4  ;;  %v1557_v3 = vld [vmem:[#allocation2 + $0x3d0] ss:$8 sps:$4 sm:$0xff]   ;;  %v1562_v4 = vld [vmem:[#allocation2 + $0x1e4] ss:$8 sps:$4 sm:$0xff]  }
  0x66   :  { %968 = vmatprep.subr.bf16.mxu0 %v1481_v7  ;;  %v1563_v7 = vld [vmem:[#allocation2 + $0x3e0] ss:$8 sps:$4 sm:$0xff]  }
  0x67   :  { %878 = vmatmul.mubr.bf16.vlgmr.msra.gmra.mrb[0].mxu1 %v57_v10  ;;  %v1566_v10 = vld [vmem:[#allocation2 + $0x1f0] ss:$8 sps:$4 sm:$0xff]  }
  0x68   :  { %960 = vmatmul.mubr.bf16.vlgmr.msra.gmra.mrb[0].mxu0 %v61_v11  ;;  %887 = vmatpush1.bf16.msra.mxu1 %v1476_v8  ;;  %v1568_v8 = vld [vmem:[#allocation2 + $0x1f4] ss:$8 sps:$4 sm:$0xff]   ;;  %v1569_v11 = vld [vmem:[#allocation2 + $0x3f0] ss:$8 sps:$4 sm:$0xff]  }
  0x69   :  { %969 = vmatpush1.bf16.msra.mxu0 %v1479_v9  ;;  %888 = vmatprep.subr.bf16.mxu1 %v1484_v12  ;;  %v1571_v9 = vld [vmem:[#allocation2 + $0x3f4] ss:$8 sps:$4 sm:$0xff]  }
  0x6a   :  { %970 = vmatprep.subr.bf16.mxu0 %v1487_v13  ;;  %918 = vmatprep.mubr.bf16.mxu1 %v60_v37  ;;  %v51_v12 = vld [vmem:[%s1729_s0 + $0x10] sm:$0xff] }
  0x6b   :  { %1000 = vmatprep.mubr.bf16.mxu0 %v64_v40  ;;  %v55_v13 = vld [vmem:[%s1729_s0 + $0x30] sm:$0xff] }
  0x6c   :  { %889 = vmatpush1.bf16.msra.mxu1 %v1482_v14  ;;  %v1572_v14 = vld [vmem:[#allocation4 + $0x40] sm:$0xff]  }
  0x6d   :  { %971 = vmatpush1.bf16.msra.mxu0 %v1485_v15  ;;  %890 = vmatprep.subr.bf16.mxu1 %v1490_v16  ;;  %v59_v15 = vpack.c.bf16 %v51_v12, %v51_v12  ;;  %v63_v16 = vpack.c.bf16 %v55_v13, %v55_v13 }
  0x6e   :  { %972 = vmatprep.subr.bf16.mxu0 %v1493_v17  ;;  %v1573_v17 = vld [vmem:[#allocation4] sm:$0xff]  }
  0x70   :  { %891 = vmatpush1.bf16.msra.mxu1 %v1488_v18  ;;  %v1574_v18 = vld [vmem:[#allocation4 + $0x48] sm:$0xff]  }
  0x71   :  { %973 = vmatpush1.bf16.msra.mxu0 %v1491_v19  ;;  %892 = vmatprep.subr.bf16.mxu1 %v1496_v20  ;;  %v1575_v19 = vld [vmem:[#allocation4 + $0x8] sm:$0xff]   ;;  %v1576_v20 = vld [vmem:[#allocation4 + $0x50] sm:$0xff]  }
  0x72   :  { %974 = vmatprep.subr.bf16.mxu0 %v1499_v21  ;;  %v1577_v21 = vld [vmem:[#allocation4 + $0x10] sm:$0xff]  }
  0x74   :  { %893 = vmatpush1.bf16.msra.mxu1 %v1494_v22  ;;  %v1578_v22 = vld [vmem:[#allocation4 + $0x58] sm:$0xff]  }
  0x75   :  { %975 = vmatpush1.bf16.msra.mxu0 %v1497_v23  ;;  %894 = vmatprep.subr.bf16.mxu1 %v1502_v24  ;;  %v1579_v23 = vld [vmem:[#allocation4 + $0x18] sm:$0xff]   ;;  %v1580_v24 = vld [vmem:[#allocation4 + $0x60] sm:$0xff]  }
  0x76   :  { %976 = vmatprep.subr.bf16.mxu0 %v1505_v25  ;;  %v1581_v25 = vld [vmem:[#allocation4 + $0x20] sm:$0xff]  }
  0x78   :  { %895 = vmatpush1.bf16.msra.mxu1 %v1500_v26  ;;  %v1582_v26 = vld [vmem:[#allocation4 + $0x68] sm:$0xff]  }
  0x79   :  { %977 = vmatpush1.bf16.msra.mxu0 %v1503_v27  ;;  %896 = vmatprep.subr.bf16.mxu1 %v1508_v28  ;;  %v1583_v27 = vld [vmem:[#allocation4 + $0x28] sm:$0xff]   ;;  %v1584_v28 = vld [vmem:[#allocation4 + $0x70] sm:$0xff]  }
  0x7a   :  { %978 = vmatprep.subr.bf16.mxu0 %v1511_v29  ;;  %v1585_v29 = vld [vmem:[#allocation4 + $0x30] sm:$0xff]  }
  0x7c   :  { %897 = vmatpush1.bf16.msra.mxu1 %v1506_v30  ;;  %v1586_v30 = vld [vmem:[#allocation4 + $0x78] sm:$0xff]  }
  0x7d   :  { %979 = vmatpush1.bf16.msra.mxu0 %v1509_v31  ;;  %898 = vmatprep.subr.bf16.mxu1 %v1514_v32  ;;  %v1587_v31 = vld [vmem:[#allocation4 + $0x38] sm:$0xff]   ;;  %v195_v32 = vlaneseq }
  0x7e   :  { %980 = vmatprep.subr.bf16.mxu0 %v1517_v33 }
  0x7f   :  { %v196_v33 = vshrl.u32 %v195_v32, 7 }
  0x80   :  { %899 = vmatpush1.bf16.msra.mxu1 %v1512_v35  ;;  %v193_v35 = vld [vmem:[%s1731_s2] sm:$0x3] }
  0x81   :  { %981 = vmatpush1.bf16.msra.mxu0 %v1515_v36  ;;  %900 = vmatprep.subr.bf16.mxu1 %v1520_v39  ;;  %v197_v34 = vsub.s32 0, %v196_v33  ;;  %v201_v36 = vsub.s32 1, %v196_v33 }
  0x82   :  { %982 = vmatprep.subr.bf16.mxu0 %v1523_v41 }
  0x83   :  { %v198_v37 = vrot.slane %v193_v35, %v197_v34  ;;  %v202_v38 = vrot.slane %v193_v35, %v201_v36 }
  0x84   :  { %901 = vmatpush1.bf16.msra.mxu1 %v1518_v42 }
  0x85   :  { %983 = vmatpush1.bf16.msra.mxu0 %v1521_v43  ;;  %902 = vmatprep.subr.bf16.mxu1 %v1526_v44 }
  0x86   :  { %984 = vmatprep.subr.bf16.mxu0 %v1529_v45 }
  0x88   :  { %903 = vmatpush1.bf16.msra.mxu1 %v1524_v46 }
  0x89   :  { %985 = vmatpush1.bf16.msra.mxu0 %v1527_v47  ;;  %904 = vmatprep.subr.bf16.mxu1 %v1532_v48 }
  0x8a   :  { %986 = vmatprep.subr.bf16.mxu0 %v1535_v49 }
  0x8c   :  { %905 = vmatpush1.bf16.msra.mxu1 %v1530_v50 }
  0x8d   :  { %987 = vmatpush1.bf16.msra.mxu0 %v1533_v51  ;;  %906 = vmatprep.subr.bf16.mxu1 %v1538_v52 }
  0x8e   :  { %988 = vmatprep.subr.bf16.mxu0 %v1541_v53 }
  0x90   :  { %907 = vmatpush1.bf16.msra.mxu1 %v1536_v54 }
  0x91   :  { %989 = vmatpush1.bf16.msra.mxu0 %v1539_v55  ;;  %908 = vmatprep.subr.bf16.mxu1 %v1544_v56  ;;  %v1323_v56 = vld [vmem:[%s1733_s4] ss:$0 sm:$0xff] }
  0x92   :  { %990 = vmatprep.subr.bf16.mxu0 %v1547_v57 }
  0x94   :  { %909 = vmatpush1.bf16.msra.mxu1 %v1542_v58 }
  0x95   :  { %991 = vmatpush1.bf16.msra.mxu0 %v1545_v59  ;;  %910 = vmatprep.subr.bf16.mxu1 %v1550_v60 }
  0x96   :  { %992 = vmatprep.subr.bf16.mxu0 %v1553_v61 }
  0x98   :  { %911 = vmatpush1.bf16.msra.mxu1 %v1548_v62 }
  0x99   :  { %993 = vmatpush1.bf16.msra.mxu0 %v1551_v63  ;;  %912 = vmatprep.subr.bf16.mxu1 %v1556_v0 }
  0x9a   :  { %994 = vmatprep.subr.bf16.mxu0 %v1559_v1 }
  0x9c   :  { %913 = vmatpush1.bf16.msra.mxu1 %v1554_v2 }
  0x9d   :  { %995 = vmatpush1.bf16.msra.mxu0 %v1557_v3  ;;  %914 = vmatprep.subr.bf16.mxu1 %v1562_v4 }
  0x9e   :  { %996 = vmatprep.subr.bf16.mxu0 %v1565_v5 }
  0xa0   :  { %915 = vmatpush1.bf16.msra.mxu1 %v1560_v6 }
  0xa1   :  { %997 = vmatpush1.bf16.msra.mxu0 %v1563_v7  ;;  %916 = vmatprep.subr.bf16.mxu1 %v1568_v8 }
  0xa2   :  { %998 = vmatprep.subr.bf16.mxu0 %v1571_v9 }
  0xa4   :  { %917 = vmatpush1.bf16.msra.mxu1 %v1566_v10 }
  0xa5   :  { %999 = vmatpush1.bf16.msra.mxu0 %v1569_v11  ;;  %1340 = vmatprep.subr.bf16.mxu1 %v1572_v14 }
  0xa7   :  { %919 = vmatmul.mubr.bf16.vlgmr.msra.gmra.mrb[0].mxu1 %v59_v15 }
  0xa8   :  { %1001 = vmatmul.mubr.bf16.vlgmr.msra.gmra.mrb[0].mxu0 %v63_v16  ;;  %1341 = vmatpush3.bf16.msra.mxu1 %v1573_v17 }
  0xa9   :  { %1342 = vmatprep.subr.bf16.mxu1 %v1574_v18 }
  0xac   :  { %1343 = vmatpush3.bf16.msra.mxu1 %v1575_v19 }
  0xad   :  { %1344 = vmatprep.subr.bf16.mxu1 %v1576_v20 }
  0xb0   :  { %1345 = vmatpush3.bf16.msra.mxu1 %v1577_v21 }
  0xb1   :  { %1346 = vmatprep.subr.bf16.mxu1 %v1578_v22 }
  0xb4   :  { %1347 = vmatpush3.bf16.msra.mxu1 %v1579_v23 }
  0xb5   :  { %1348 = vmatprep.subr.bf16.mxu1 %v1580_v24 }
  0xb8   :  { %1349 = vmatpush3.bf16.msra.mxu1 %v1581_v25 }
  0xb9   :  { %1350 = vmatprep.subr.bf16.mxu1 %v1582_v26 }
  0xbc   :  { %1351 = vmatpush3.bf16.msra.mxu1 %v1583_v27 }
  0xbd   :  { %1352 = vmatprep.subr.bf16.mxu1 %v1584_v28 }
  0xc0   :  { %1353 = vmatpush3.bf16.msra.mxu1 %v1585_v29 }
  0xc1   :  { %1354 = vmatprep.subr.bf16.mxu1 %v1586_v30 }
  0xc4   :  { %1355 = vmatpush3.bf16.msra.mxu1 %v1587_v31 }
 0x17a   :  { %v920_v39 = vpop.f32.mrb[0].mxu1 }
 0x17b   :  { %v1002_v40 = vpop.f32.mrb[0].mxu0  ;;  %v1362_v41 = vadd.f32 %v920_v39, %v198_v37  ;;  %v922_v42 = vpop.f32.mrb[1].mxu1 }
 0x17c   :  { %v1004_v43 = vpop.f32.mrb[1].mxu0  ;;  %v1364_v44 = vadd.f32 %v922_v42, %v202_v38  ;;  %v924_v45 = vpop.f32.mrb[2].mxu1 }
 0x17d   :  { %v1006_v46 = vpop.f32.mrb[2].mxu0  ;;  %v1363_v47 = vadd.f32 %v1362_v41, %v1002_v40  ;;  %v925_v48 = vpop.f32.mrb[3].mxu1 }
 0x17e   :  { %v1007_v49 = vpop.f32.mrb[3].mxu0  ;;  %v1365_v50 = vadd.f32 %v1364_v44, %v1004_v43 }
 0x17f   :  { %v1009_v51 = vmax.f32 %v1363_v47, 0.0 }
 0x180   :  { %v1010_v52 = vmax.f32 %v1365_v50, 0.0 }
 0x181   :  { %v1011_v54 = vpack.c.bf16 %v1009_v51, %v1009_v51 }
 0x182   :  { %v1012_v53 = vpack.c.bf16 %v1010_v52, %v1010_v52 }
 0x184   :  { %1180 = vmatprep.mubr.bf16.mxu1 %v1012_v53 }
 0x185   :  { %1181 = vmatmul.mubr.bf16.vlgmr.msra.gmra.mrb[4].mxu1 %v1011_v54 }
 0x258   :  { %v1356_v55 = vpop.f32.mrb[4].mxu1 }
 0x259   :  { %v1357_v57 = vpop.f32.mrb[5].mxu1 }
 0x25a   :  { %v1358_v58 = vadd.f32 %v1357_v57, %v1356_v55  ;;  %v1359_v59 = vpop.f32.mrb[6].mxu1 }
 0x25b   :  { %v1360_v60 = vpop.f32.mrb[7].mxu1 }
 0x25c   :  { %v1183_v61 = vadd.f32 %v1358_v58, %v1323_v56 }
 0x25e   :  { %1188 = vst [vmem:[%s1734_s5] sm:$0xff] %v1183_v61 }
 0x25f   :  { %1193 = vsyncpa [#allocation3], 1 }
 0x260   :  { %1194 = vsyncpa [#allocation5], 1 }

</bundles_post_ra>
